<compile_context>
chip_gen: v5e
topology: v5e:2x2
jax: 0.10.0
libtpu: 0.0.40
codegen_flags: <defaults>
</compile_context>

<pallas_src>
from functools import partial

import jax
import jax.numpy as jnp
from jax.experimental import pallas as pl
from jax.experimental.pallas import tpu as pltpu


def _mean_filter_kernel(x_ref, o_ref, *, k, p, H, W):
    """x_ref/o_ref: (B, H*W) blocks, each row one flattened image plane."""
    HW = H * W
    B = x_ref.shape[0]
    x = x_ref[...].astype(jnp.float32)                    # lane-dense load

    # ---- H (row) pass: flat shifts by multiples of W.  The zero extension
    #      of the flat axis exactly matches the zero padding along H, so no
    #      masking is required.
    rsum = x
    if p:
        zrow = jnp.zeros((B, p * W), jnp.float32)
        xp = jnp.concatenate([zrow, x, zrow], axis=-1)    # (B, HW + 2*p*W)
        rsum = xp[:, 0:HW]
        for i in range(1, k):
            rsum = rsum + xp[:, i * W: i * W + HW]

    # ---- W (column) pass: flat shifts by +-d.  Lanes that would wrap into
    #      the neighbouring image row are zeroed (== zero padding) with a
    #      per-lane mask (iota computed once, VPU selects per shift).
    acc = rsum
    if p:
        col = jax.lax.broadcasted_iota(jnp.int32, (B, HW), 1) % W
        zcol = jnp.zeros((B, p), jnp.float32)
        rp = jnp.concatenate([zcol, rsum, zcol], axis=-1)  # (B, HW + 2*p)
        for d in range(1, p + 1):
            left = jnp.where(col >= d, rp[:, p - d: p - d + HW], 0.0)
            right = jnp.where(col < W - d, rp[:, p + d: p + d + HW], 0.0)
            acc = acc + left + right

    o_ref[...] = (acc * (1.0 / (k * k))).astype(o_ref.dtype)


def _choose_block_planes(NC, max_bnc):
    """Planes per block: multiple of 8 (sublane tile) or the full plane count;
    prefers a divisor of NC (no pad pass) and >= 2 grid steps (v7x megacore)."""
    if NC <= 8 or (NC <= max_bnc and NC % 8 != 0):
        return NC                                   # one full block
    target_steps = 4 if NC >= 32 else 2
    cap = min(max_bnc, max(8, (NC // target_steps) // 8 * 8))
    for b in range(cap, 0, -8):
        if NC % b == 0:
            return b
    if NC <= max_bnc:
        return NC
    return max_bnc                                  # ragged fallback (pads plane axis)


@partial(jax.jit, static_argnames=("kernel_size",))
def mean_filter(x, kernel_size=3):
    """Same as F.avg_pool2d(x, k, stride=1, padding=k//2) for NCHW input (odd k)."""
    N, C, H, W = x.shape
    k = int(kernel_size)
    if k % 2 != 1:
        # TODO(synk): even kernel_size gives (H+1, W+1) outputs with asymmetric
        # windows; only the module's default odd-k path is implemented here.
        raise NotImplementedError("mean_filter: only odd kernel_size supported")
    p = k // 2
    NC, HW = N * C, H * W

    # Contiguous (free) reshape: each plane becomes one lane-dense row.
    xr = x.reshape(NC, HW)

    # ---- per-generation VMEM limit and real (padded) block footprint ----
    try:
        phys_vmem = pltpu.get_tpu_info().vmem_capacity_bytes
    except Exception:
        phys_vmem = 64 << 20                        # assume smallest (v7x per-TC)
    vmem_limit = (32 << 20) if phys_vmem <= (64 << 20) else (48 << 20)

    lane_w = pl.cdiv(HW, 128) * 128                 # lane-padded plane width
    # per plane-row: 2x double-buffered input + 2x output blocks + ~4 live
    # f32 temporaries inside the body  -> ~8 f32 rows of lane_w each
    per_plane_bytes = lane_w * 4 * 8
    max_bnc = min(1024, (vmem_limit // 2) // per_plane_bytes)
    max_bnc = max(8, (max_bnc // 8) * 8)

    Bnc = _choose_block_planes(NC, max_bnc)
    num_blocks = pl.cdiv(NC, Bnc)
    NCp = num_blocks * Bnc
    if NCp != NC:                                   # rare fallback only
        xr = jnp.pad(xr, ((0, NCp - NC), (0, 0)))

    out = pl.pallas_call(
        partial(_mean_filter_kernel, k=k, p=p, H=H, W=W),
        out_shape=jax.ShapeDtypeStruct((NCp, HW), x.dtype),
        grid=(num_blocks,),
        in_specs=[pl.BlockSpec((Bnc, HW), lambda i: (i, 0))],
        out_specs=pl.BlockSpec((Bnc, HW), lambda i: (i, 0)),
        compiler_params=pltpu.CompilerParams(
            dimension_semantics=("parallel",),
            vmem_limit_bytes=vmem_limit,
        ),
    )(xr)

    if NCp != NC:
        out = out[:NC]
    return out.reshape(N, C, H, W)


def _reference(x, kernel_size=3):
    # pure-JAX reference: avg_pool2d, stride 1, padding k//2, count_include_pad=True
    k = kernel_size
    p = k // 2
    s = jax.lax.reduce_window(
        x, 0.0, jax.lax.add,
        window_dimensions=(1, 1, k, k),
        window_strides=(1, 1, 1, 1),
        padding=((0, 0), (0, 0), (p, p), (p, p)))
    return s / (k * k)


if __name__ == "__main__":
    key = jax.random.PRNGKey(0)
    x = jax.random.normal(key, (2, 4, 16, 16), dtype=jnp.float32)

    y = mean_filter(x, kernel_size=3)
    jax.block_until_ready(y)

    y_ref = _reference(x, kernel_size=3)
    assert y.shape == x.shape, (y.shape, x.shape)
    assert jnp.allclose(y, y_ref, atol=1e-5, rtol=1e-5), "mismatch vs reference"

    print("KERNEL_OK")
</pallas_src>

<mosaic_0001>
module attributes {stable_mosaic.version = 11 : i64} {
  func.func @_mean_filter_kernel(%arg0: i32, %arg1: memref<8x256xf32, #tpu.memory_space<vmem>>, %arg2: memref<8x256xf32, #tpu.memory_space<vmem>>) attributes {dimension_semantics = [#tpu.dimension_semantics<parallel>], iteration_bounds = array<i64: 1>, scalar_prefetch = 0 : i64, scratch_operands = 0 : i64, tpu.core_type = #tpu.core_type<tc>, window_params = [{transform_indices = @transform_0, window_bounds = array<i64: 8, 256>}, {transform_indices = @transform_1, window_bounds = array<i64: 8, 256>}]} {
    %c0 = arith.constant 0 : index
    %c0_0 = arith.constant 0 : index
    %0 = vector.load %arg1[%c0, %c0_0] : memref<8x256xf32, #tpu.memory_space<vmem>>, vector<8x256xf32>
    %cst = arith.constant 0.000000e+00 : f32
    %1 = vector.broadcast %cst : f32 to vector<8x16xf32>
    %2 = tpu.concatenate %1, %0, %1 in 1 : vector<8x16xf32>, vector<8x256xf32>, vector<8x16xf32> -> vector<8x288xf32>
    %3 = vector.extract_strided_slice %2 {offsets = [0, 0], sizes = [8, 256], strides = [1, 1]} : vector<8x288xf32> to vector<8x256xf32>
    %4 = vector.extract_strided_slice %2 {offsets = [0, 16], sizes = [8, 256], strides = [1, 1]} : vector<8x288xf32> to vector<8x256xf32>
    %5 = arith.addf %3, %4 : vector<8x256xf32>
    %6 = vector.extract_strided_slice %2 {offsets = [0, 32], sizes = [8, 256], strides = [1, 1]} : vector<8x288xf32> to vector<8x256xf32>
    %7 = arith.addf %5, %6 : vector<8x256xf32>
    %8 = tpu.iota {dimensions = array<i32: 1>} : vector<8x256xi32>
    %c16_i32 = arith.constant 16 : i32
    %c0_i32 = arith.constant 0 : i32
    %9 = arith.cmpi eq, %c16_i32, %c0_i32 : i32
    %c1_i32 = arith.constant 1 : i32
    %10 = arith.select %9, %c1_i32, %c16_i32 : i32
    %11 = vector.broadcast %10 : i32 to vector<8x256xi32>
    %12 = arith.remsi %8, %11 : vector<8x256xi32>
    %c0_i32_1 = arith.constant 0 : i32
    %13 = vector.broadcast %c0_i32_1 : i32 to vector<8x256xi32>
    %14 = arith.cmpi ne, %12, %13 : vector<8x256xi32>
    %c0_i32_2 = arith.constant 0 : i32
    %15 = vector.broadcast %c0_i32_2 : i32 to vector<8x256xi32>
    %16 = arith.cmpi slt, %12, %15 : vector<8x256xi32>
    %c0_i32_3 = arith.constant 0 : i32
    %17 = arith.cmpi slt, %10, %c0_i32_3 : i32
    %18 = vector.broadcast %17 : i1 to vector<8x256xi1>
    %19 = vector.broadcast %18 : vector<8x256xi1> to vector<8x256xi1>
    %20 = arith.xori %16, %19 : vector<8x256xi1>
    %21 = arith.andi %20, %14 : vector<8x256xi1>
    %22 = vector.broadcast %10 : i32 to vector<8x256xi32>
    %23 = arith.addi %12, %22 : vector<8x256xi32>
    %24 = arith.select %21, %23, %12 : vector<8x256xi1>, vector<8x256xi32>
    %cst_4 = arith.constant 0.000000e+00 : f32
    %25 = vector.broadcast %cst_4 : f32 to vector<8x1xf32>
    %26 = tpu.concatenate %25, %7, %25 in 1 : vector<8x1xf32>, vector<8x256xf32>, vector<8x1xf32> -> vector<8x258xf32>
    %c1_i32_5 = arith.constant 1 : i32
    %27 = vector.broadcast %c1_i32_5 : i32 to vector<8x256xi32>
    %28 = arith.cmpi sge, %24, %27 : vector<8x256xi32>
    %29 = vector.extract_strided_slice %26 {offsets = [0, 0], sizes = [8, 256], strides = [1, 1]} : vector<8x258xf32> to vector<8x256xf32>
    %cst_6 = arith.constant 0.000000e+00 : f32
    %30 = vector.broadcast %cst_6 : f32 to vector<8x256xf32>
    %31 = arith.select %28, %29, %30 : vector<8x256xi1>, vector<8x256xf32>
    %c15_i32 = arith.constant 15 : i32
    %32 = vector.broadcast %c15_i32 : i32 to vector<8x256xi32>
    %33 = arith.cmpi slt, %24, %32 : vector<8x256xi32>
    %34 = vector.extract_strided_slice %26 {offsets = [0, 2], sizes = [8, 256], strides = [1, 1]} : vector<8x258xf32> to vector<8x256xf32>
    %cst_7 = arith.constant 0.000000e+00 : f32
    %35 = vector.broadcast %cst_7 : f32 to vector<8x256xf32>
    %36 = arith.select %33, %34, %35 : vector<8x256xi1>, vector<8x256xf32>
    %37 = arith.addf %7, %31 : vector<8x256xf32>
    %38 = arith.addf %37, %36 : vector<8x256xf32>
    %cst_8 = arith.constant 0.111111112 : f32
    %39 = vector.broadcast %cst_8 : f32 to vector<8x256xf32>
    %40 = arith.mulf %38, %39 : vector<8x256xf32>
    %c0_9 = arith.constant 0 : index
    %c0_10 = arith.constant 0 : index
    %41 = vector.load %arg2[%c0_9, %c0_10] : memref<8x256xf32, #tpu.memory_space<vmem>>, vector<8x256xf32>
    tpu.vector_store %arg2[%c0_9, %c0_10], %40 {strides = array<i32>} : memref<8x256xf32, #tpu.memory_space<vmem>>, vector<8x256xf32>,
    return
  }
  func.func @transform_0(%arg0: i32) -> (i32, i32) {
    %c0_i32 = arith.constant 0 : i32
    %c0_i32_0 = arith.constant 0 : i32
    return %arg0, %c0_i32 : i32, i32
  }
  func.func @transform_1(%arg0: i32) -> (i32, i32) {
    %c0_i32 = arith.constant 0 : i32
    %c0_i32_0 = arith.constant 0 : i32
    return %arg0, %c0_i32 : i32, i32
  }
}

</mosaic_0001>

<bundles_post_ra>
// kernel: mean_filter.1
= control target key start
LH: loop header
LB: loop body
LE: loop exit
PB: predicated region body
PF: predicated region fallthrough
CT: control target
= control target key end

     0   :  { %s129_s8 = smov 16   ;;  %vm16_vm0 = vcmask 130048   ;;  %s130_s11 = smov 112   ;;  %vm31_vm1 = vcmask 916480   ;;  %vm44_vm2 = vcmask 785408   ;;  %vm84_vm3 = vcmask 7168   ;;  %s158_s0 = inlined_call_operand.vmem [shape: f32[8,256], index: 0, kind: input, shape index: {}]   ;;  %s159_s1 = inlined_call_operand.vmem [shape: f32[8,256], index: 1, kind: output, shape index: {}]  }
   0x1   :  { %v8_v0 = vld [vmem:[%s158_s0] sm:$0xff]  ;;  %v9_v1 = vld [vmem:[%s158_s0 + $0x8] sm:$0xff]  ;;  %s131_s12 = smov 96   ;;  %s132_s0 = smov 1   ;;  %v51_v26 = vlaneseq  ;;  %vm105_vm5 = vcmask 1031168  }
   0x2   :  { %12 = vrot.lane.b32.xlu0 %v8_v0, %s129_s8  ;;  %s133_s13 = smov 126  }
   0x3   :  { %v52_v27 = vand.u32 127, %v51_v26 }
   0x5   :  { %v58_v28 = vand.u32 15, %v52_v27  ;;  %v53_v37 = vadd.s32 128, %v52_v27 }
   0x7   :  { %vm91_vm4 = vcmp.ge.s32.totalorder %v58_v28, 1  ;;  %vm95_vm6 = vcmp.lt.s32.totalorder %v58_v28, 15  ;;  %v65_v38 = vand.u32 15, %v53_v37 }
   0x9   :  { %vm92_vm7 = vcmp.ge.s32.totalorder %v65_v38, 1  ;;  %vm96_vm8 = vcmp.lt.s32.totalorder %v65_v38, 15 }
   0xa   :  { %14 = vrot.lane.b32.xlu0 %v9_v1, %s129_s8 }
  0x74   :  { %v13_v2 = vpop.permute.xlu0 %12 }
  0x75   :  { %v21_v3 = vsel %vm16_vm0, 0.0, %v13_v2 }
  0x76   :  { %25 = vrot.lane.b32.xlu1 %v21_v3, %s130_s11 }
  0x7c   :  { %v15_v4 = vpop.permute.xlu0 %14 }
  0x7d   :  { %v22_v5 = vsel %vm16_vm0, %v15_v4, 0.0  ;;  %v17_v6 = vsel %vm16_vm0, %v13_v2, %v15_v4 }
  0x7e   :  { %29 = vrot.lane.b32.xlu2 %v22_v5, %s130_s11  ;;  %40 = vrot.lane.b32.xlu0 %v17_v6, %s131_s12 }
  0x7f   :  { %27 = vrot.lane.b32.xlu1 %v17_v6, %s130_s11 }
  0x86   :  { %38 = vrot.lane.b32.xlu2 %v21_v3, %s131_s12 }
  0x87   :  { %42 = vrot.lane.b32.xlu1 %v22_v5, %s131_s12 }
  0xd8   :  { %v30_v8 = vpop.permute.xlu2 %29 }
  0xe0   :  { %v39_v12 = vpop.permute.xlu2 %38 }
  0xe8   :  { %v26_v7 = vpop.permute.xlu1 %25 }
  0xf0   :  { %v41_v9 = vpop.permute.xlu0 %40 }
  0xf1   :  { %v28_v10 = vpop.permute.xlu1 %27  ;;  %v45_v14 = vsel %vm44_vm2, %v39_v12, %v41_v9 }
  0xf2   :  { %v32_v11 = vsel %vm31_vm1, %v26_v7, %v28_v10  ;;  %v33_v16 = vsel %vm31_vm1, %v28_v10, %v30_v8 }
  0xf3   :  { %v36_v13 = vadd.f32 %v32_v11, %v21_v3  ;;  %v37_v17 = vadd.f32 %v33_v16, %v17_v6 }
  0xf5   :  { %v49_v15 = vadd.f32 %v45_v14, %v36_v13 }
  0xf7   :  { %80 = vrot.lane.b32.xlu2 %v49_v15, %s132_s0 }
  0xf9   :  { %v43_v18 = vpop.permute.xlu1 %42 }
  0xfa   :  { %v46_v19 = vsel %vm44_vm2, %v41_v9, %v43_v18 }
  0xfb   :  { %v50_v20 = vadd.f32 %v46_v19, %v37_v17 }
  0xfd   :  { %82 = vrot.lane.b32.xlu0 %v50_v20, %s132_s0 }
 0x151   :  { %v81_v21 = vpop.permute.xlu2 %80 }
 0x152   :  { %v89_v22 = vsel %vm84_vm3, 0.0, %v81_v21 }
 0x153   :  { %99 = vrot.lane.b32.xlu1 %v89_v22, %s133_s13  ;;  %v93_v29 = vsel %vm91_vm4, %v89_v22, 0.0 }
 0x154   :  { %v112_v32 = vadd.f32 %v93_v29, %v49_v15 }
 0x16f   :  { %v83_v23 = vpop.permute.xlu0 %82 }
 0x170   :  { %v90_v24 = vsel %vm84_vm3, %v83_v23, 0.0  ;;  %v85_v25 = vsel %vm84_vm3, %v81_v21, %v83_v23 }
 0x171   :  { %103 = vrot.lane.b32.xlu0 %v90_v24, %s133_s13  ;;  %101 = vrot.lane.b32.xlu2 %v85_v25, %s133_s13  ;;  %v94_v39 = vsel %vm92_vm7, %v85_v25, 0.0 }
 0x172   :  { %v113_v41 = vadd.f32 %v94_v39, %v50_v20 }
 0x1c5   :  { %v100_v30 = vpop.permute.xlu1 %99 }
 0x1cb   :  { %v102_v31 = vpop.permute.xlu2 %101 }
 0x1cc   :  { %v106_v33 = vsel %vm105_vm5, %v100_v30, %v102_v31 }
 0x1cd   :  { %v110_v34 = vsel %vm95_vm6, %v106_v33, 0.0 }
 0x1ce   :  { %v114_v35 = vadd.f32 %v112_v32, %v110_v34 }
 0x1d0   :  { %v116_v36 = vmul.f32 0.11111111, %v114_v35 }
 0x1d2   :  { %118 = vst [vmem:[%s159_s1] sm:$0xff] %v116_v36 }
 0x1e3   :  { %v104_v40 = vpop.permute.xlu0 %103 }
 0x1e4   :  { %v107_v42 = vsel %vm105_vm5, %v102_v31, %v104_v40 }
 0x1e5   :  { %v111_v43 = vsel %vm96_vm8, %v107_v42, 0.0 }
 0x1e6   :  { %v115_v44 = vadd.f32 %v113_v41, %v111_v43 }
 0x1e8   :  { %v117_v45 = vmul.f32 0.11111111, %v115_v44 }
 0x1ea   :  { %119 = vst [vmem:[%s159_s1 + $0x8] sm:$0xff] %v117_v45 }

</bundles_post_ra>
